<compile_context>
chip_gen: v7x
topology: tpu7x:2x2x1
jax: 0.10.0
libtpu: 0.0.40
codegen_flags: <defaults>
</compile_context>

<pallas_src>
import functools

import jax
import jax.numpy as jnp
from jax.experimental import pallas as pl
from jax.experimental.pallas import tpu as pltpu


def _make_cutouts_kernel(x_ref, noise_ref, facs_ref, o_ref, *, inv_p):
    """One grid step = one lane-dense chunk of flattened output pixels.

    x_ref:     (P, bf)      VMEM  pooling phases for this chunk (P = kh*kw)
    noise_ref: (cutn, bf)   VMEM  per-cutout gaussian noise for this chunk
    facs_ref:  (cutn, 1)    VMEM  per-cutout uniform noise scale
    o_ref:     (cutn, bf)   VMEM  lane-dense output chunk
    """
    phases = x_ref[...].astype(jnp.float32)                  # one contiguous load
    acc_sum = jnp.sum(phases, axis=0, keepdims=True)         # (1, bf) sublane reduce (XLU)
    acc_max = jnp.max(phases, axis=0, keepdims=True)         # (1, bf)
    pooled = acc_sum * (0.5 * inv_p) + acc_max * 0.5         # (avg + max) / 2, computed once

    # Vectorized over all cutouts: (1,bf) + (cutn,1) * (cutn,bf) -> (cutn,bf)
    o_ref[...] = (pooled + facs_ref[...] * noise_ref[...]).astype(o_ref.dtype)


def _pick_block_f(F, P, cutn, max_block_bytes=4 << 20):
    """Largest multiple-of-128 divisor of F within a per-step VMEM budget."""
    if F % 128 != 0:
        return F  # block == full array extent is always legal
    bytes_per_lane = 4 * (P + 2 * cutn)          # x column + noise + out columns (f32)
    cap = max(128, max_block_bytes // bytes_per_lane)
    n128 = F // 128
    best = 128
    for d in range(1, n128 + 1):
        if n128 % d == 0 and d * 128 <= cap:
            best = d * 128
    return best


def make_cutouts(x, facs, noise, *, cut_size, cutn):
    """x: (B, C, H, W) float32, facs: (cutn,), noise: (cutn*B, C, cs, cs)."""
    B, C, H, W = x.shape
    assert B == 1, "reference facs broadcast ([cutn,1,1,1] vs cutn*B) requires B == 1"
    assert H % cut_size == 0 and W % cut_size == 0, "uniform adaptive-pool bins only"
    kh, kw = H // cut_size, W // cut_size
    BC = B * C
    P = kh * kw                       # pooling window size (phases)
    F = BC * cut_size * cut_size      # flattened output pixels per cutout

    # Phase decomposition (XLA-side layout plumbing): x_phases[i*kw + j, bc*cs*cs + oi*cs + oj]
    #   = x[bc, oi*kh + i, oj*kw + j]
    x_phases = (
        x.reshape(BC, cut_size, kh, cut_size, kw)
         .transpose(2, 4, 0, 1, 3)
         .reshape(P, F)
    )
    noise_flat = noise.reshape(cutn, F)
    facs_col = facs.reshape(cutn, 1).astype(jnp.float32)

    block_f = _pick_block_f(F, P, cutn)
    nb = F // block_f

    kernel = functools.partial(_make_cutouts_kernel, inv_p=1.0 / P)

    out_flat = pl.pallas_call(
        kernel,
        out_shape=jax.ShapeDtypeStruct((cutn, F), x.dtype),
        grid=(nb,),
        in_specs=[
            # pooling phases for this lane chunk (contiguous, lane-dense)
            pl.BlockSpec((P, block_f), lambda m: (0, m)),
            # per-cutout noise for this lane chunk
            pl.BlockSpec((cutn, block_f), lambda m: (0, m)),
            # per-cutout scale factors (tiny, same block every step)
            pl.BlockSpec((cutn, 1), lambda m: (0, 0)),
        ],
        out_specs=pl.BlockSpec((cutn, block_f), lambda m: (0, m)),
        compiler_params=pltpu.CompilerParams(
            dimension_semantics=("parallel",),   # disjoint output chunks -> v7x megacore
            vmem_limit_bytes=32 * 1024 * 1024,
        ),
    )(x_phases, noise_flat, facs_col)

    return out_flat.reshape(cutn * B, C, cut_size, cut_size)


def ref_make_cutouts(x, facs, noise, *, cut_size, cutn):
    """Pure-JAX reference of the (non-augmented) forward pass."""
    B, C, H, W = x.shape
    kh, kw = H // cut_size, W // cut_size
    xr = x.reshape(B, C, cut_size, kh, cut_size, kw)
    avg = xr.mean(axis=(3, 5))
    mx = xr.max(axis=(3, 5))
    pooled = (avg + mx) * 0.5
    batch = jnp.concatenate([pooled] * cutn, axis=0)           # (cutn*B, C, cs, cs)
    return batch + facs.reshape(cutn, 1, 1, 1) * noise


if __name__ == "__main__":
    CUT_SIZE = 8
    CUTN = 4
    NOISE_FAC = 0.1
    B, C, H, W = 1, 4, 16, 16   # B == 1 required by the reference facs broadcast

    key = jax.random.PRNGKey(0)
    kx, kf, kn = jax.random.split(key, 3)

    x = jax.random.uniform(kx, (B, C, H, W), jnp.float32)                    # NCHW
    facs = jax.random.uniform(kf, (CUTN,), jnp.float32, 0.0, NOISE_FAC)      # U(0, noise_fac)
    noise = jax.random.normal(kn, (CUTN * B, C, CUT_SIZE, CUT_SIZE), jnp.float32)

    out = make_cutouts(x, facs, noise, cut_size=CUT_SIZE, cutn=CUTN)
    out = jax.block_until_ready(out)

    assert out.shape == (CUTN * B, C, CUT_SIZE, CUT_SIZE), out.shape

    ref = ref_make_cutouts(x, facs, noise, cut_size=CUT_SIZE, cutn=CUTN)
    assert jnp.allclose(out, ref, atol=1e-5, rtol=1e-5), float(jnp.max(jnp.abs(out - ref)))

    print("KERNEL_OK")
</pallas_src>

<mosaic_0001>
module attributes {stable_mosaic.version = 11 : i64} {
  func.func @_make_cutouts_kernel(%arg0: i32, %arg1: memref<4x256xf32, #tpu.memory_space<vmem>>, %arg2: memref<4x256xf32, #tpu.memory_space<vmem>>, %arg3: memref<4x1xf32, #tpu.memory_space<vmem>>, %arg4: memref<4x256xf32, #tpu.memory_space<vmem>>) attributes {dimension_semantics = [#tpu.dimension_semantics<parallel>], iteration_bounds = array<i64: 1>, scalar_prefetch = 0 : i64, scratch_operands = 0 : i64, tpu.core_type = #tpu.core_type<tc>, window_params = [{transform_indices = @transform_0, window_bounds = array<i64: 4, 256>}, {transform_indices = @transform_1, window_bounds = array<i64: 4, 256>}, {pipeline_mode = #tpu.pipeline_mode<synchronous>, transform_indices = @transform_2, window_bounds = array<i64: 4, 1>}, {transform_indices = @transform_3, window_bounds = array<i64: 4, 256>}]} {
    %c0 = arith.constant 0 : index
    %c0_0 = arith.constant 0 : index
    %0 = vector.load %arg1[%c0, %c0_0] : memref<4x256xf32, #tpu.memory_space<vmem>>, vector<4x256xf32>
    %cst = arith.constant dense<0.000000e+00> : vector<256xf32>
    %1 = vector.multi_reduction <add>, %0, %cst [0] : vector<4x256xf32> to vector<256xf32>
    %2 = vector.shape_cast %1 : vector<256xf32> to vector<1x256xf32>
    %cst_1 = arith.constant dense<0xFF800000> : vector<256xf32>
    %3 = vector.multi_reduction <maximumf>, %0, %cst_1 [0] : vector<4x256xf32> to vector<256xf32>
    %4 = vector.shape_cast %3 : vector<256xf32> to vector<1x256xf32>
    %cst_2 = arith.constant 1.250000e-01 : f32
    %5 = vector.broadcast %cst_2 : f32 to vector<1x256xf32>
    %6 = arith.mulf %2, %5 : vector<1x256xf32>
    %cst_3 = arith.constant 5.000000e-01 : f32
    %7 = vector.broadcast %cst_3 : f32 to vector<1x256xf32>
    %8 = arith.mulf %4, %7 : vector<1x256xf32>
    %9 = arith.addf %6, %8 : vector<1x256xf32>
    %c0_4 = arith.constant 0 : index
    %c0_5 = arith.constant 0 : index
    %10 = vector.load %arg3[%c0_4, %c0_5] : memref<4x1xf32, #tpu.memory_space<vmem>>, vector<4x1xf32>
    %c0_6 = arith.constant 0 : index
    %c0_7 = arith.constant 0 : index
    %11 = vector.load %arg2[%c0_6, %c0_7] : memref<4x256xf32, #tpu.memory_space<vmem>>, vector<4x256xf32>
    %12 = vector.broadcast %10 : vector<4x1xf32> to vector<4x256xf32>
    %13 = arith.mulf %12, %11 : vector<4x256xf32>
    %14 = vector.broadcast %9 : vector<1x256xf32> to vector<4x256xf32>
    %15 = arith.addf %14, %13 : vector<4x256xf32>
    %c0_8 = arith.constant 0 : index
    %c0_9 = arith.constant 0 : index
    %16 = vector.load %arg4[%c0_8, %c0_9] : memref<4x256xf32, #tpu.memory_space<vmem>>, vector<4x256xf32>
    tpu.vector_store %arg4[%c0_8, %c0_9], %15 {strides = array<i32>} : memref<4x256xf32, #tpu.memory_space<vmem>>, vector<4x256xf32>,
    return
  }
  func.func @transform_0(%arg0: i32) -> (i32, i32) {
    %c0_i32 = arith.constant 0 : i32
    %c0_i32_0 = arith.constant 0 : i32
    return %c0_i32, %arg0 : i32, i32
  }
  func.func @transform_1(%arg0: i32) -> (i32, i32) {
    %c0_i32 = arith.constant 0 : i32
    %c0_i32_0 = arith.constant 0 : i32
    return %c0_i32, %arg0 : i32, i32
  }
  func.func @transform_2(%arg0: i32) -> (i32, i32) {
    %c0_i32 = arith.constant 0 : i32
    %c0_i32_0 = arith.constant 0 : i32
    %c0_i32_1 = arith.constant 0 : i32
    return %c0_i32, %c0_i32_0 : i32, i32
  }
  func.func @transform_3(%arg0: i32) -> (i32, i32) {
    %c0_i32 = arith.constant 0 : i32
    %c0_i32_0 = arith.constant 0 : i32
    return %c0_i32, %arg0 : i32, i32
  }
}

</mosaic_0001>

<bundles_post_ra>
// kernel: tpu_custom_call.1
= control target key start
LH: loop header
LB: loop body
LE: loop exit
PB: predicated region body
PF: predicated region fallthrough
CT: control target
= control target key end

     0   :  { %8 = vsyncpa [#allocation3], 0  ;;  %s207_s0 = inlined_call_operand.hbm [shape: f32[4,256], index: 0, kind: input, shape index: {}]   ;;  %s208_s1 = inlined_call_operand.vmem [shape: f32[4,256], index: 1, kind: input, shape index: {}]   ;;  %s209_s2 = inlined_call_operand.vmem [shape: f32[4,1], index: 2, kind: input, shape index: {}]   ;;  %s210_s3 = inlined_call_operand.hbm [shape: f32[4,256], index: 3, kind: output, shape index: {}]  }
   0x1   :  { %9 = vsyncpa [#allocation4], 0  ;;  %s154_s12 = smov [#allocation2]   ;;  %s106_s16 = scalar_lea.hbm %s207_s0, 128 }
   0x2   :  { %s16_s13 = sshll.u32 %s154_s12, 4  ;;  %p107_p0 = scmp.ne.s32.totalorder %s207_s0, %s106_s16  ;;  %s17_s13 = int_to_ptr.vmem [resolvable:$true] %s16_s13 }
   0x3   :  { %p110_p1 = scmp.lt.u32.totalorder %s106_s16, %s207_s0 }
   0x5   :  { %p112_p2 = pnand %p110_p1, %p107_p0 }
   0x7   :  { %115 = shalt.err (!%p112_p2)
}
   0x8   :  { %s116_s21 = scalar_lea.vmem %s17_s13, 128  ;;  %p121_p4 = scmp.lt.s32.totalorder %s17_s13, %s17_s13 }
   0x9   :  { %p117_p3 = scmp.ne.s32.totalorder %s17_s13, %s116_s21  ;;  %p122_p5 = scmp.lt.s32.totalorder %s116_s21, %s116_s21 }
   0xb   :  { %p123_p6 = por %p122_p5, %p121_p4 }
   0xd   :  { %p124_p7 = pnand %p123_p6, %p117_p3 }
   0xf   :  { %127 = shalt.err (!%p124_p7)
}
  0x10   :  { %19 = dma.hbm_to_vmem [thread:$0]  %s207_s0, 128, %s17_s13, [#allocation3]  }
  0x11   :  { %150 = dma.done.wait [#allocation3], 128  }
  0x12   :  { %151 = vsyncadd [#allocation3], 4294967168  ;;  %v155_v0 = vmov 0   ;;  %v66_v1 = vld [vmem:[%s209_s2] sm:$0xf]  ;;  %vm31_vm0 = vcmask 1043456  }
  0x13   :  { %103 = vset.pattern.permute.xlu0 %v155_v0  ;;  %v27_v2 = vld [vmem:[#allocation2] sm:$0xff]  ;;  %s156_s26 = smov [#allocation5]  }
  0x14   :  { %70 = vperm.xlu0 %103, %v66_v1   ;;  %v29_v3 = vcombine.high %v27_v2, %v27_v2  ;;  %v32_v4 = vsel %vm31_vm0, %v27_v2, 0.0  ;;  %v46_v6 = vsel %vm31_vm0, %v27_v2, -inf  ;;  %v67_v32 = vld [vmem:[%s208_s1] sm:$0xff]  ;;  %s91_s27 = sshll.u32 %s156_s26, 4  ;;  %s92_s27 = int_to_ptr.vmem [resolvable:$true] %s91_s27 }
  0x15   :  { %v33_v8 = vrot.slane %v32_v4, 4  ;;  %v47_v10 = vrot.slane %v46_v6, 4  ;;  %v74_v37 = vcombine.high %v67_v32, %v67_v32  ;;  %s128_s28 = scalar_lea.vmem %s92_s27, 128  ;;  %p133_p9 = scmp.lt.s32.totalorder %s92_s27, %s92_s27 }
  0x16   :  { %v39_v5 = vsel %vm31_vm0, %v29_v3, 0.0  ;;  %v53_v7 = vsel %vm31_vm0, %v29_v3, -inf  ;;  %p129_p8 = scmp.ne.s32.totalorder %s92_s27, %s128_s28  ;;  %p134_p10 = scmp.lt.s32.totalorder %s128_s28, %s128_s28 }
  0x17   :  { %v40_v9 = vrot.slane %v39_v5, 4  ;;  %v54_v11 = vrot.slane %v53_v7, 4  ;;  %v34_v12 = vadd.f32 %v33_v8, %v32_v4  ;;  %v48_v14 = vmax.f32 %v46_v6, %v47_v10 }
  0x18   :  { %p135_p11 = por %p134_p10, %p133_p9 }
  0x19   :  { %v41_v13 = vadd.f32 %v40_v9, %v39_v5  ;;  %v55_v15 = vmax.f32 %v53_v7, %v54_v11  ;;  %v35_v16 = vrot.slane %v34_v12, 2  ;;  %v49_v18 = vrot.slane %v48_v14, 2 }
  0x1a   :  { %p136_p12 = pnand %p135_p11, %p129_p8 }
  0x1b   :  { %v42_v17 = vrot.slane %v41_v13, 2  ;;  %v56_v19 = vrot.slane %v55_v15, 2  ;;  %v36_v20 = vadd.f32 %v35_v16, %v34_v12  ;;  %v50_v22 = vmax.f32 %v48_v14, %v49_v18 }
  0x1d   :  { %v43_v21 = vadd.f32 %v42_v17, %v41_v13  ;;  %v57_v23 = vmax.f32 %v55_v15, %v56_v19  ;;  %v37_v24 = vrot.slane %v36_v20, 1  ;;  %v51_v26 = vrot.slane %v50_v22, 1 }
  0x1f   :  { %v44_v25 = vrot.slane %v43_v21, 1  ;;  %v58_v27 = vrot.slane %v57_v23, 1  ;;  %v38_v28 = vadd.f32 %v37_v24, %v36_v20  ;;  %v52_v30 = vmax.f32 %v50_v22, %v51_v26 }
  0x21   :  { %v45_v29 = vadd.f32 %v44_v25, %v43_v21  ;;  %v59_v31 = vmax.f32 %v57_v23, %v58_v27  ;;  %v60_v33 = vmul.f32 0.125, %v38_v28  ;;  %v62_v35 = vmul.f32 0.5, %v52_v30 }
  0x23   :  { %v61_v34 = vmul.f32 0.125, %v45_v29  ;;  %v63_v36 = vmul.f32 0.5, %v59_v31  ;;  %v64_v38 = vadd.f32 %v62_v35, %v60_v33 }
  0x25   :  { %v65_v39 = vadd.f32 %v63_v36, %v61_v34 }
  0x93   :  { %v71_v40 = vpop.permute.xlu0 %70 }
  0x94   :  { %v76_v41 = vmul.f32 %v71_v40, %v67_v32  ;;  %v77_v42 = vmul.f32 %v74_v37, %v71_v40 }
  0x96   :  { %v78_v43 = vadd.f32 %v76_v41, %v64_v38  ;;  %v79_v44 = vadd.f32 %v77_v42, %v65_v39 }
  0x98   :  { %v82_v45 = vcombine.low %v78_v43, %v79_v44 }
  0x9a   :  { %84 = vst [vmem:[#allocation5] sm:$0xff] %v82_v45 }
  0x9b   :  { %139 = shalt.err (!%p136_p12)
}
  0x9c   :  { %s140_s30 = scalar_lea.hbm %s210_s3, 128 }
  0x9d   :  { %p141_p13 = scmp.ne.s32.totalorder %s210_s3, %s140_s30  ;;  %p144_p0 = scmp.lt.u32.totalorder %s140_s30, %s210_s3 }
  0x9f   :  { %p146_p1 = pnand %p144_p0, %p141_p13 }
  0xa1   :  { %149 = shalt.err (!%p146_p1)
}
  0xa2   :  { %94 = dma.vmem_to_hbm [thread:$0]  %s92_s27, 128, %s210_s3, [#allocation4]  }
  0xa3   :  { %152 = dma.done.wait [#allocation4], 128  }
  0xa4   :  { %153 = vsyncadd [#allocation4], 4294967168 }
  0xa5   :  { %98 = vsyncpa [#allocation3], 1 }
  0xa6   :  { %99 = vsyncpa [#allocation4], 1 }

</bundles_post_ra>
